<compile_context>
chip_gen: v6e
topology: v6e:2x2x1
jax: 0.10.0
libtpu: 0.0.40
codegen_flags: <defaults>
</compile_context>

<pallas_src>
import numpy as np
import jax
import jax.numpy as jnp
from jax.experimental import pallas as pl
from jax.experimental.pallas import tpu as pltpu


_MIB = 1024 * 1024
_LANES = 128


# ----------------------------------------------------------------------------
# Generation-aware sizing helpers
# ----------------------------------------------------------------------------
def _tpu_vmem_capacity_bytes():
    try:
        info = pltpu.get_tpu_info()
        cap = getattr(info, "vmem_capacity_bytes", None)
        if cap:
            return int(cap)
    except Exception:
        pass
    return 64 * _MIB  # conservative (v7x-sized) fallback


def _block_budget_bytes():
    # Larger blocks amortize the ~0.35us per-grid-step overhead: ~8 MiB on
    # 128 MiB-VMEM parts (v5e/v6e), ~4 MiB on 64 MiB parts (v7x).
    return 8 * _MIB if _tpu_vmem_capacity_bytes() >= 96 * _MIB else 4 * _MIB


def _vmem_limit_bytes(block_bytes):
    # Explicit scoped-VMEM limit: double-buffered blocks + slack, clamped to
    # physical capacity (the scoped default is only 16 MiB on v5e / 32 MiB).
    cap = _tpu_vmem_capacity_bytes()
    return int(min(cap, max(2 * block_bytes + 2 * _MIB, 16 * _MIB)))


def _largest_divisor_leq(n, cap):
    cap = max(1, min(n, cap))
    for d in range(cap, 0, -1):
        if n % d == 0:
            return d
    return 1


def _largest_mult8_divisor_leq(n, cap):
    """Largest divisor of n that is a multiple of 8 and <= cap (n % 8 == 0)."""
    cap = min(n, max(cap, 8))
    d = cap - (cap % 8)
    while d >= 8:
        if n % d == 0:
            return d
        d -= 8
    return 8


# ----------------------------------------------------------------------------
# Kernel 1: stacked_abs == sqrt(field_to_intensity(field)) == |field|
# ----------------------------------------------------------------------------
def _stacked_abs_kernel(x_ref, m_ref, out_ref):
    # x_ref: (rb, 256) interleaved [re, im, re, im, ...] pairs (lane-dense).
    # m_ref: (256, 128) 0/1 pair-sum matrix, M[2k, k] = M[2k+1, k] = 1.
    # De-interleave + pairwise re^2+im^2 reduction runs on the (otherwise idle)
    # MXU at full f32 precision — no XLA gather, no lane shuffles.
    x = x_ref[...].astype(jnp.float32)   # f32 accumulation (f16-safe)
    sq = x * x
    mag2 = jnp.dot(sq, m_ref[...],
                   preferred_element_type=jnp.float32,
                   precision=jax.lax.Precision.HIGHEST)
    out_ref[...] = jnp.sqrt(mag2).astype(out_ref.dtype)


def stacked_abs(field):
    """|field| for a stacked-complex field of shape (..., 2) -> (...)."""
    if field.shape[-1] != 2:
        raise ValueError("stacked-complex field must have a trailing dim of 2")
    out_shape = field.shape[:-1]
    total = int(np.prod(out_shape))
    n_flat = 2 * total

    flat = field.reshape(-1)                     # free view of interleaved data
    pad = (-n_flat) % (16 * _LANES)              # rows % 8 == 0, cols = 2*128
    if pad:
        flat = jnp.pad(flat, (0, pad))
    rows = (n_flat + pad) // (2 * _LANES)
    x2d = flat.reshape(rows, 2 * _LANES)

    # Constant pair-sum / de-interleave matrix (resident across grid steps).
    m_np = np.zeros((2 * _LANES, _LANES), dtype=np.float32)
    m_np[np.arange(2 * _LANES), np.arange(2 * _LANES) // 2] = 1.0
    m = jnp.asarray(m_np)

    itemsize = jnp.dtype(field.dtype).itemsize
    per_row = (2 * _LANES) * itemsize + _LANES * itemsize
    rb = _largest_mult8_divisor_leq(rows, _block_budget_bytes() // max(per_row, 1))
    block_bytes = rb * per_row + (2 * _LANES) * _LANES * 4

    out2d = pl.pallas_call(
        _stacked_abs_kernel,
        out_shape=jax.ShapeDtypeStruct((rows, _LANES), field.dtype),
        grid=(rows // rb,),
        in_specs=[
            pl.BlockSpec((rb, 2 * _LANES), lambda i: (i, 0)),
            pl.BlockSpec((2 * _LANES, _LANES), lambda i: (0, 0)),  # resident
        ],
        out_specs=pl.BlockSpec((rb, _LANES), lambda i: (i, 0)),
        compiler_params=pltpu.CompilerParams(
            dimension_semantics=("parallel",),
            vmem_limit_bytes=_vmem_limit_bytes(block_bytes)),
    )(x2d, m)

    out_flat = out2d.reshape(-1)
    if pad:
        out_flat = out_flat[:total]
    return out_flat.reshape(out_shape)


# ----------------------------------------------------------------------------
# Kernel 2: fused centered pad/crop on interleaved (N, H, 2W) planes
# ----------------------------------------------------------------------------
def _make_resize_kernel(h_out, w_out, ch, oy, iy, cw, ox, ix):
    """Copy the overlapping window (crop on input side, pad on output side) and
    fill only the border with the scalar pad value.  Each output element is
    written exactly once; pure crops do no fill work at all."""
    pad_top = oy > 0
    pad_bot = oy + ch < h_out
    pad_left = ox > 0
    pad_right = ox + cw < w_out
    any_pad = pad_top or pad_bot or pad_left or pad_right

    def kernel(pv_ref, in_ref, out_ref):
        nb = out_ref.shape[0]
        dt = out_ref.dtype
        # interior copy (single write per element)
        out_ref[:, oy:oy + ch, ox:ox + cw] = in_ref[:, iy:iy + ch, ix:ix + cw]
        if any_pad:
            pv = pv_ref[0]
            # TODO(synk): building the interior band as one full-lane-width row
            # (pv | window | pv) and issuing a single unmasked store would
            # remove the lane-masked left/right stores (binding on v5e's single
            # vst slot), but needs unaligned lane concatenation in Mosaic.
            if pad_top:
                out_ref[:, 0:oy, :] = jnp.full((nb, oy, w_out), pv, dt)
            if pad_bot:
                out_ref[:, oy + ch:, :] = jnp.full((nb, h_out - oy - ch, w_out), pv, dt)
            if pad_left:
                out_ref[:, oy:oy + ch, 0:ox] = jnp.full((nb, ch, ox), pv, dt)
            if pad_right:
                out_ref[:, oy:oy + ch, ox + cw:] = jnp.full((nb, ch, w_out - ox - cw), pv, dt)

    return kernel


def _resize_planes(planes, out_h, out_w, padval, ch, oy, iy, cw, ox, ix):
    """planes (N, h_in, w_in) -> (N, out_h, out_w) with the given fused
    centered pad/crop offsets (already in element units of the last axis)."""
    N, h_in, w_in = planes.shape
    itemsize = jnp.dtype(planes.dtype).itemsize
    plane_bytes = (h_in * w_in + out_h * out_w) * itemsize
    # TODO(synk): at very large resolutions a single interleaved plane exceeds
    # the per-block budget (4K f32 ~ 66 MiB); the proper fix is H row-band
    # tiling of the copy window (element-offset input windows / manual DMA),
    # which would also let v7x's 2 TensorCores split small-batch resizes, let
    # crops DMA only the cropped input window, and enable pl.Buffered(3).
    nb = _largest_divisor_leq(N, max(_block_budget_bytes() // max(plane_bytes, 1), 1))
    block_bytes = nb * plane_bytes

    kernel = _make_resize_kernel(out_h, out_w, ch, oy, iy, cw, ox, ix)
    pv = jnp.asarray(padval, dtype=planes.dtype).reshape((1,))
    return pl.pallas_call(
        kernel,
        out_shape=jax.ShapeDtypeStruct((N, out_h, out_w), planes.dtype),
        grid=(N // nb,),
        in_specs=[
            pl.BlockSpec(memory_space=pltpu.MemorySpace.SMEM),
            pl.BlockSpec((nb, h_in, w_in), lambda i: (i, 0, 0)),
        ],
        out_specs=pl.BlockSpec((nb, out_h, out_w), lambda i: (i, 0, 0)),
        compiler_params=pltpu.CompilerParams(
            dimension_semantics=("parallel",),
            vmem_limit_bytes=_vmem_limit_bytes(block_bytes)),
    )(pv, planes)


def _centered_offsets(n_in, n_out):
    c = min(n_in, n_out)                 # copied extent
    o = max((n_out - n_in) // 2, 0)      # output offset (pad)
    i = max((n_in - n_out) // 2, 0)      # input offset (crop)
    return c, o, i


def _resize_field(field, target_hw, padval):
    """field (..., H, W, 2) -> (..., H_t, W_t, 2) fused centered pad/crop.
    Works on the interleaved (N, H, 2W) view (free reshapes, no transposes)."""
    *lead, H, W, S = field.shape
    H_t, W_t = int(target_hw[0]), int(target_hw[1])
    if (H_t, W_t) == (H, W):
        return field
    planes = field.reshape((-1, H, W * S))
    ch, oy, iy = _centered_offsets(H, H_t)
    cw, ox, ix = _centered_offsets(W, W_t)
    out = _resize_planes(planes, H_t, W_t * S, padval,
                         ch, oy, iy, cw * S, ox * S, ix * S)
    return out.reshape(tuple(lead) + (H_t, W_t, S))


# ----------------------------------------------------------------------------
# PropagationBase
# ----------------------------------------------------------------------------
class PropagationBase:
    image_native_pitch = None
    """Interface for propagation functions, with some shared functions."""

    def __init__(self, propagation_distance, slm_resolution, slm_pixel_pitch,
                 image_resolution=None, wavelength=5.32e-07,
                 propagation_parameters=None, device=None):
        self.slm_resolution = np.array(slm_resolution)
        self.slm_pixel_pitch = np.array(slm_pixel_pitch)
        self.propagation_distance = propagation_distance
        self.wavelength = wavelength
        self.dev = device
        if image_resolution is None:
            self.image_resolution = self.slm_resolution
        else:
            self.image_resolution = np.array(image_resolution)
        if self.image_native_pitch is None:
            self.image_native_pitch = self.slm_pixel_pitch
        self.image_pixel_pitch = self.image_native_pitch
        self.slm_size = self.slm_pixel_pitch * self.slm_resolution
        self.image_size = self.image_pixel_pitch * self.image_resolution
        self.propagation_parameters = propagation_parameters
        if self.propagation_parameters is None:
            self.propagation_parameters = {}
        try:
            self.padding_type = self.propagation_parameters.pop('padding_type')
        except KeyError:
            self.padding_type = 'zero'

    def forward(self, input_field):
        # Abstract in the reference module as well.
        raise NotImplementedError('Must implement in derived class')

    def backward(self, input_field):
        raise NotImplementedError('Must implement in derived class')

    def get_pad_value(self, field, pytorch=True):
        if self.padding_type == 'zero':
            return jnp.zeros((), dtype=field.dtype)
        elif self.padding_type == 'median':
            # median(|f|) == sqrt(median(|f|^2)) (sqrt monotone): the f32
            # intensity fuses into the sort operand (f16-safe, no |f|
            # intermediate), one scalar sqrt at the end.
            # TODO(synk): the global median needs a full sort; no clean Pallas
            # equivalent (a 2-pass histogram select would avoid O(n log n)), so
            # it runs in plain JAX with torch.median semantics (lower middle).
            re = field[..., 0].astype(jnp.float32)
            im = field[..., 1].astype(jnp.float32)
            flat = jnp.sort((re * re + im * im).reshape(-1))
            return jnp.sqrt(flat[(flat.size - 1) // 2]).astype(field.dtype)
        else:
            raise ValueError('Unknown padding type')

    def pad_smaller_dims(self, field, target_shape, pytorch=True, padval=None):
        if padval is None:
            padval = self.get_pad_value(field, pytorch)
        in_hw = np.array(field.shape[-3:-1])
        target = np.maximum(in_hw, np.array(target_shape))
        return _resize_field(field, target, padval)

    def crop_larger_dims(self, field, target_shape, pytorch=True):
        in_hw = np.array(field.shape[-3:-1])
        target = np.minimum(in_hw, np.array(target_shape))
        return _resize_field(field, target, jnp.zeros((), field.dtype))

    def resize_to_image(self, field):
        """Fused pad_smaller_dims + crop_larger_dims to image_resolution in a
        single pallas_call (identical result to the sequential pair)."""
        padval = self.get_pad_value(field)
        return _resize_field(field, self.image_resolution, padval)


# ----------------------------------------------------------------------------
# Pure-JAX reference for correctness checking
# ----------------------------------------------------------------------------
def _ref_resize_to_image(field, image_resolution, padding_type):
    re, im = field[..., 0], field[..., 1]
    mag = jnp.sqrt(re * re + im * im)
    if padding_type == 'median':
        flat = jnp.sort(mag.reshape(-1))
        padval = flat[(flat.size - 1) // 2]
    else:
        padval = jnp.zeros((), field.dtype)
    H_in, W_in = field.shape[2], field.shape[3]
    H_t, W_t = int(image_resolution[0]), int(image_resolution[1])
    # pad smaller dims (centered, floor on the front side)
    H_p, W_p = max(H_in, H_t), max(W_in, W_t)
    pt, pw = (H_p - H_in) // 2, (W_p - W_in) // 2
    f = jnp.pad(field,
                ((0, 0), (0, 0), (pt, H_p - H_in - pt), (pw, W_p - W_in - pw), (0, 0)),
                constant_values=padval)
    # crop larger dims (centered, floor on the front side)
    ct, cw = (H_p - H_t) // 2, (W_p - W_t) // 2
    return f[:, :, ct:ct + H_t, cw:cw + W_t, :]


if __name__ == "__main__":
    key = jax.random.PRNGKey(0)
    B, C, H, W = 2, 1, 16, 32
    field = jax.random.normal(key, (B, C, H, W, 2), dtype=jnp.float32)

    # --- stacked_abs kernel (interleaved input + MXU pair-sum) ---
    mag = jax.block_until_ready(stacked_abs(field))
    mag_ref = jnp.sqrt(field[..., 0] ** 2 + field[..., 1] ** 2)
    np.testing.assert_allclose(np.asarray(mag), np.asarray(mag_ref),
                               rtol=1e-5, atol=1e-6)

    # ragged size exercises the lane-dense padding path
    rag = jax.random.normal(jax.random.PRNGKey(1), (2, 3, 5, 2), jnp.float32)
    mag_r = jax.block_until_ready(stacked_abs(rag))
    mag_r_ref = jnp.sqrt(rag[..., 0] ** 2 + rag[..., 1] ** 2)
    np.testing.assert_allclose(np.asarray(mag_r), np.asarray(mag_r_ref),
                               rtol=1e-5, atol=1e-6)

    # --- fused resize: pad H (16->24), crop W (32->16), median padding ---
    prop = PropagationBase(
        propagation_distance=0.05,
        slm_resolution=(H, W),
        slm_pixel_pitch=(6.4e-6, 6.4e-6),
        image_resolution=(24, 16),
        wavelength=532e-9,
        propagation_parameters={'padding_type': 'median'},
    )
    out = jax.block_until_ready(prop.resize_to_image(field))
    assert out.shape == (B, C, 24, 16, 2), out.shape
    ref = _ref_resize_to_image(field, (24, 16), 'median')
    np.testing.assert_allclose(np.asarray(out), np.asarray(ref),
                               rtol=1e-6, atol=1e-6)

    # sequential pad-then-crop API must match the fused path
    padded = prop.pad_smaller_dims(field, prop.image_resolution)
    seq = jax.block_until_ready(prop.crop_larger_dims(padded, prop.image_resolution))
    np.testing.assert_allclose(np.asarray(seq), np.asarray(ref),
                               rtol=1e-6, atol=1e-6)

    # --- fused resize: crop H (16->12), pad W (32->40), zero padding ---
    prop2 = PropagationBase(
        propagation_distance=0.05,
        slm_resolution=(H, W),
        slm_pixel_pitch=(6.4e-6, 6.4e-6),
        image_resolution=(12, 40),
        wavelength=532e-9,
        propagation_parameters={'padding_type': 'zero'},
    )
    out2 = jax.block_until_ready(prop2.resize_to_image(field))
    assert out2.shape == (B, C, 12, 40, 2), out2.shape
    ref2 = _ref_resize_to_image(field, (12, 40), 'zero')
    np.testing.assert_allclose(np.asarray(out2), np.asarray(ref2),
                               rtol=1e-6, atol=1e-6)

    print("KERNEL_OK")
</pallas_src>

<mosaic_0001>
module attributes {stable_mosaic.version = 11 : i64} {
  func.func @_stacked_abs_kernel(%arg0: i32, %arg1: memref<8x256xf32, #tpu.memory_space<vmem>>, %arg2: memref<256x128xf32, #tpu.memory_space<vmem>>, %arg3: memref<8x128xf32, #tpu.memory_space<vmem>>) attributes {dimension_semantics = [#tpu.dimension_semantics<parallel>], iteration_bounds = array<i64: 1>, scalar_prefetch = 0 : i64, scratch_operands = 0 : i64, tpu.core_type = #tpu.core_type<tc>, window_params = [{transform_indices = @transform_0, window_bounds = array<i64: 8, 256>}, {pipeline_mode = #tpu.pipeline_mode<synchronous>, transform_indices = @transform_1, window_bounds = array<i64: 256, 128>}, {transform_indices = @transform_2, window_bounds = array<i64: 8, 128>}]} {
    %c0 = arith.constant 0 : index
    %c0_0 = arith.constant 0 : index
    %0 = vector.load %arg1[%c0, %c0_0] : memref<8x256xf32, #tpu.memory_space<vmem>>, vector<8x256xf32>
    %1 = arith.mulf %0, %0 : vector<8x256xf32>
    %c0_1 = arith.constant 0 : index
    %c0_2 = arith.constant 0 : index
    %2 = vector.load %arg2[%c0_1, %c0_2] : memref<256x128xf32, #tpu.memory_space<vmem>>, vector<256x128xf32>
    %cst = arith.constant dense<0.000000e+00> : vector<8x128xf32>
    %3 = tpu.matmul %1, %2, %cst {dimension_numbers = #tpu.dot_dimension_numbers<[1], [0], [0], [1], [0, 0, 1, 1], [], []>, precision = #tpu.contract_precision<fp32>} : vector<8x256xf32>, vector<256x128xf32>, vector<8x128xf32> -> vector<8x128xf32>
    %4 = math.sqrt %3 : vector<8x128xf32>
    %c0_3 = arith.constant 0 : index
    %c0_4 = arith.constant 0 : index
    %5 = vector.load %arg3[%c0_3, %c0_4] : memref<8x128xf32, #tpu.memory_space<vmem>>, vector<8x128xf32>
    tpu.vector_store %arg3[%c0_3, %c0_4], %4 {strides = array<i32>} : memref<8x128xf32, #tpu.memory_space<vmem>>, vector<8x128xf32>,
    return
  }
  func.func @transform_0(%arg0: i32) -> (i32, i32) {
    %c0_i32 = arith.constant 0 : i32
    %c0_i32_0 = arith.constant 0 : i32
    return %arg0, %c0_i32 : i32, i32
  }
  func.func @transform_1(%arg0: i32) -> (i32, i32) {
    %c0_i32 = arith.constant 0 : i32
    %c0_i32_0 = arith.constant 0 : i32
    %c0_i32_1 = arith.constant 0 : i32
    return %c0_i32, %c0_i32_0 : i32, i32
  }
  func.func @transform_2(%arg0: i32) -> (i32, i32) {
    %c0_i32 = arith.constant 0 : i32
    %c0_i32_0 = arith.constant 0 : i32
    return %arg0, %c0_i32 : i32, i32
  }
}

</mosaic_0001>

<bundles_post_ra>
// kernel: tpu_custom_call.1
= control target key start
LH: loop header
LB: loop body
LE: loop exit
PB: predicated region body
PF: predicated region fallthrough
CT: control target
= control target key end

     0   :  { %7 = vsyncpa [#allocation3], 0  ;;  %s1874_s0 = inlined_call_operand.hbm [shape: f32[8,256], index: 0, kind: input, shape index: {}]   ;;  %s1875_s1 = inlined_call_operand.hbm [shape: f32[256,128], index: 1, kind: input, shape index: {}]   ;;  %s1876_s2 = inlined_call_operand.hbm [shape: f32[8,128], index: 2, kind: output, shape index: {}]  }
   0x1   :  { %8 = vsyncpa [#allocation6], 0 }
   0x2   :  { %9 = vsyncpa [#allocation4], 0  ;;  %s1243_s9 = smov [#allocation2]   ;;  %s1244_s11 = smov [#allocation5]  }
   0x3   :  { %s16_s10 = sshll.u32 %s1243_s9, 4  ;;  %s25_s12 = sshll.u32 %s1244_s11, 4  ;;  %s17_s10 = int_to_ptr.vmem [resolvable:$true] %s16_s10  ;;  %s26_s12 = int_to_ptr.vmem [resolvable:$true] %s25_s12 }
   0x4   :  { %s1185_s13 = scalar_lea.vmem %s17_s10, 256  ;;  %p1190_p1 = scmp.lt.s32.totalorder %s17_s10, %s17_s10 }
   0x5   :  { %p1186_p0 = scmp.ne.s32.totalorder %s17_s10, %s1185_s13  ;;  %p1191_p2 = scmp.lt.s32.totalorder %s1185_s13, %s1185_s13 }
   0x7   :  { %p1192_p3 = por %p1191_p2, %p1190_p1 }
   0x9   :  { %p1193_p4 = pnand %p1192_p3, %p1186_p0 }
   0xb   :  { %1196 = shalt.err (!%p1193_p4)
}
   0xc   :  { %19 = dma.hbm_to_vmem [thread:$0]  %s1874_s0, 256, %s17_s10, [#allocation3]  }
   0xd   :  { %s1205_s16 = scalar_lea.vmem %s26_s12, 4096  ;;  %p1210_p6 = scmp.lt.s32.totalorder %s26_s12, %s26_s12 }
   0xe   :  { %p1206_p5 = scmp.ne.s32.totalorder %s26_s12, %s1205_s16  ;;  %p1211_p7 = scmp.lt.s32.totalorder %s1205_s16, %s1205_s16 }
  0x10   :  { %p1212_p8 = por %p1211_p7, %p1210_p6 }
  0x12   :  { %p1213_p9 = pnand %p1212_p8, %p1206_p5 }
  0x14   :  { %1216 = shalt.err (!%p1213_p9)
}
  0x15   :  { %s1245_s17 = smov 128   ;;  %s1246_s18 = smov 8  }
  0x16   :  { %31 = dma.hbm_to_vmem [thread:$0]  %s1875_s1, 4096, %s26_s12, [#allocation6], %s1245_s17, %s1245_s17, %s1246_s18  }
  0x17   :  { %1237 = dma.done.wait [#allocation3], 256  }
  0x18   :  { %1238 = vsyncadd [#allocation3], 4294967040 }
  0x19   :  { %1239 = dma.done.wait [#allocation6], 4096  }
  0x1a   :  { %1240 = vsyncadd [#allocation6], 4294963200  ;;  %v73_v0 = vld [vmem:[#allocation5 + $0xf8] sm:$0xff]  ;;  %v72_v2 = vld [vmem:[#allocation5 + $0xf0] sm:$0xff]  ;;  %s1247_s0 = smov [#allocation7]  }
  0x1b   :  { %v57_v1 = vld [vmem:[#allocation5 + $0x78] sm:$0xff]  ;;  %v1269_v3 = vand.u32 4294901760, %v73_v0  ;;  %v1273_v5 = vand.u32 4294901760, %v72_v2  ;;  %v56_v6 = vld [vmem:[#allocation5 + $0x70] sm:$0xff]  ;;  %v71_v7 = vld [vmem:[#allocation5 + $0xe8] sm:$0xff]  ;;  %s950_s1 = sshll.u32 %s1247_s0, 4  ;;  %s951_s1 = int_to_ptr.vmem [resolvable:$true] %s950_s1 }
  0x1c   :  { %v1271_v4 = vand.u32 4294901760, %v57_v1  ;;  %v55_v8 = vld [vmem:[#allocation5 + $0x68] sm:$0xff]  ;;  %v1275_v9 = vand.u32 4294901760, %v56_v6  ;;  %v1277_v10 = vand.u32 4294901760, %v71_v7  ;;  %v70_v12 = vld [vmem:[#allocation5 + $0xe0] sm:$0xff]  ;;  %v69_v14 = vld [vmem:[#allocation5 + $0xd8] sm:$0xff]  ;;  %p1222_p11 = scmp.lt.s32.totalorder %s951_s1, %s951_s1 }
  0x1d   :  { %v1279_v11 = vand.u32 4294901760, %v55_v8  ;;  %v54_v13 = vld [vmem:[#allocation5 + $0x60] sm:$0xff]  ;;  %960 = vmatprep.subr.mxu0 %v1269_v3  ;;  %v1282_v15 = vand.u32 4294901760, %v70_v12  ;;  %v1286_v17 = vand.u32 4294901760, %v69_v14  ;;  %v1289_v18 = vsub.f32 %v73_v0, %v1269_v3  ;;  %v1291_v19 = vld [vmem:[#allocation5 + $0x58] sm:$0xff]  ;;  %v1293_v20 = vld [vmem:[#allocation5 + $0xd0] sm:$0xff] }
  0x1e   :  { %v1284_v16 = vand.u32 4294901760, %v54_v13  ;;  %v1295_v21 = vld [vmem:[#allocation5 + $0x50] sm:$0xff]  ;;  %961 = vmatpush3.msra.mxu0 %v1271_v4  ;;  %v1299_v22 = vand.u32 4294901760, %v1291_v19  ;;  %v1302_v23 = vsub.f32 %v57_v1, %v1271_v4  ;;  %v1305_v24 = vand.u32 4294901760, %v1293_v20  ;;  %v1310_v26 = vld [vmem:[#allocation5 + $0xc8] sm:$0xff]  ;;  %v1314_v28 = vld [vmem:[#allocation5 + $0xc0] sm:$0xff] }
  0x1f   :  { %v1308_v25 = vsub.f32 %v72_v2, %v1273_v5  ;;  %v1312_v27 = vld [vmem:[#allocation5 + $0x48] sm:$0xff]  ;;  %962 = vmatprep.subr.mxu0 %v1273_v5  ;;  %v1890_v29 = vand.u32 4294901760, %v1289_v18  ;;  %v1319_v30 = vand.u32 4294901760, %v1295_v21  ;;  %v1322_v31 = vsub.f32 %v56_v6, %v1275_v9  ;;  %v1336_v37 = vld [vmem:[#allocation5 + $0x40] sm:$0xff]  ;;  %v1360_v46 = vld [vmem:[#allocation5 + $0xb8] sm:$0xff]  ;;  %s1217_s21 = scalar_lea.vmem %s951_s1, 128 }
  0x20   :  { %v1325_v32 = vand.u32 4294901760, %v1310_v26  ;;  %963 = vmatpush3.msra.mxu0 %v1275_v9  ;;  %v1888_v33 = vand.u32 4294901760, %v1302_v23  ;;  %v1331_v35 = vsub.f32 %v71_v7, %v1277_v10  ;;  %v1334_v36 = vand.u32 4294901760, %v1312_v27  ;;  %v1370_v51 = vld [vmem:[#allocation5 + $0x38] sm:$0xff]  ;;  %v1377_v56 = vld [vmem:[#allocation5 + $0xb0] sm:$0xff]  ;;  %v1401_v2 = vld [vmem:[#allocation5 + $0xa8] sm:$0xff]  ;;  %p1218_p10 = scmp.ne.s32.totalorder %s951_s1, %s1217_s21  ;;  %p1223_p12 = scmp.lt.s32.totalorder %s1217_s21, %s1217_s21 }
  0x21   :  { %1946 = vst [vmem:[#allocation11_spill] sm:$0xff] %v1319_v30  ;;  %v1887_v34 = vand.u32 4294901760, %v1308_v25  ;;  %964 = vmatprep.subr.mxu0 %v1277_v10  ;;  %v302_v38 = vsub.f32 %v1289_v18, %v1890_v29  ;;  %v1885_v39 = vand.u32 4294901760, %v1322_v31  ;;  %v1344_v40 = vsub.f32 %v55_v8, %v1279_v11  ;;  %v1389_v61 = vld [vmem:[#allocation5 + $0x30] sm:$0xff] }
  0x22   :  { %1947 = vst [vmem:[#allocation12_spill] sm:$0xff] %v1325_v32  ;;  %1948 = vst [vmem:[#allocation13_spill] sm:$0xff] %v1334_v36  ;;  %v1347_v41 = vand.u32 4294901760, %v1314_v28  ;;  %965 = vmatpush3.msra.mxu0 %v1279_v11  ;;  %v190_v42 = vsub.f32 %v1302_v23, %v1888_v33  ;;  %v1883_v44 = vand.u32 4294901760, %v1331_v35  ;;  %v1358_v45 = vsub.f32 %v70_v12, %v1282_v15  ;;  %p1224_p13 = por %p1223_p12, %p1222_p11 }
  0x23   :  { %v309_v43 = vsub.f32 %v1308_v25, %v1887_v34  ;;  %966 = vmatprep.subr.mxu0 %v1282_v15  ;;  %v303_v47 = vand.u32 4294901760, %v302_v38  ;;  %v197_v48 = vsub.f32 %v1322_v31, %v1885_v39  ;;  %v1882_v49 = vand.u32 4294901760, %v1344_v40  ;;  %v1492_v39 = vld [vmem:[#allocation5 + $0x90] sm:$0xff] }
  0x24   :  { %1949 = vst [vmem:[#allocation14_spill] sm:$0xff] %v1347_v41  ;;  %v1368_v50 = vand.u32 4294901760, %v1336_v37  ;;  %967 = vmatpush3.msra.mxu0 %v1284_v16  ;;  %v191_v52 = vand.u32 4294901760, %v190_v42  ;;  %v316_v54 = vsub.f32 %v1331_v35, %v1883_v44  ;;  %v1880_v55 = vand.u32 4294901760, %v1358_v45  ;;  %v1502_v34 = vld [vmem:[#allocation5 + $0x10] sm:$0xff]  ;;  %p1225_p0 = pnand %p1224_p13, %p1218_p10 }
  0x25   :  { %v310_v53 = vand.u32 4294901760, %v309_v43  ;;  %968 = vmatprep.subr.mxu0 %v1286_v17  ;;  %995 = vmatprep.subr.mxu1 %v303_v47  ;;  %v198_v57 = vand.u32 4294901760, %v197_v48  ;;  %v204_v58 = vsub.f32 %v1344_v40, %v1882_v49  ;;  %v1384_v59 = vsub.f32 %v54_v13, %v1284_v16  ;;  %v1412_v13 = vld [vmem:[#allocation5 + $0x28] sm:$0xff]  ;;  %v1479_v49 = vld [vmem:[#allocation5 + $0x18] sm:$0xff] }
  0x26   :  { %1950 = vst [vmem:[#allocation15_spill] sm:$0xff] %v1368_v50  ;;  %v1387_v60 = vand.u32 4294901760, %v1360_v46  ;;  %969 = vmatpush3.msra.mxu0 %v1299_v22  ;;  %996 = vmatpush3.msra.mxu1 %v191_v52  ;;  %v317_v62 = vand.u32 4294901760, %v316_v54  ;;  %v323_v63 = vsub.f32 %v1358_v45, %v1880_v55  ;;  %v1396_v0 = vsub.f32 %v69_v14, %v1286_v17 }
  0x27   :  { %v1399_v1 = vand.u32 4294901760, %v1370_v51  ;;  %970 = vmatprep.subr.mxu0 %v1305_v24  ;;  %997 = vmatprep.subr.mxu1 %v310_v53  ;;  %v205_v6 = vand.u32 4294901760, %v204_v58  ;;  %v1878_v7 = vand.u32 4294901760, %v1384_v59  ;;  %v1407_v8 = vsub.f32 %v1291_v19, %v1299_v22 }
  0x28   :  { %1951 = vst [vmem:[#allocation16_spill] sm:$0xff] %v1387_v60  ;;  %v1410_v12 = vand.u32 4294901760, %v1377_v56  ;;  %971 = vmatpush3.msra.mxu0 %v1319_v30  ;;  %998 = vmatpush3.msra.mxu1 %v198_v57  ;;  %v324_v14 = vand.u32 4294901760, %v323_v63  ;;  %v1877_v38 = vand.u32 4294901760, %v1396_v0  ;;  %v1418_v42 = vsub.f32 %v1293_v20, %v1305_v24  ;;  %v1435_v20 = vld [vmem:[#allocation5 + $0xa0] sm:$0xff] }
  0x29   :  { %1952 = vst [vmem:[#allocation17_spill] sm:$0xff] %v1399_v1  ;;  %v1421_v43 = vand.u32 4294901760, %v1389_v61  ;;  %972 = vmatprep.subr.mxu0 %v1325_v32  ;;  %999 = vmatprep.subr.mxu1 %v317_v62  ;;  %v211_v19 = vsub.f32 %v1384_v59, %v1878_v7  ;;  %v1879_v47 = vand.u32 4294901760, %v1407_v8  ;;  %v1430_v48 = vsub.f32 %v1295_v21, %v1319_v30 }
  0x2a   :  { %1953 = vst [vmem:[#allocation18_spill] sm:$0xff] %v1410_v12  ;;  %v1433_v52 = vand.u32 4294901760, %v1401_v2  ;;  %973 = vmatpush3.msra.mxu0 %v1334_v36  ;;  %1000 = vmatpush3.msra.mxu1 %v205_v6  ;;  %v330_v53 = vsub.f32 %v1396_v0, %v1877_v38  ;;  %v1881_v54 = vand.u32 4294901760, %v1418_v42  ;;  %v1444_v57 = vsub.f32 %v1310_v26, %v1325_v32  ;;  %v1458_v38 = vld [vmem:[#allocation5 + $0x20] sm:$0xff] }
  0x2b   :  { %1954 = vst [vmem:[#allocation19_spill] sm:$0xff] %v1421_v43  ;;  %v1447_v21 = vand.u32 4294901760, %v1412_v13  ;;  %974 = vmatprep.subr.mxu0 %v1347_v41  ;;  %1001 = vmatprep.subr.mxu1 %v324_v14  ;;  %v212_v58 = vand.u32 4294901760, %v211_v19  ;;  %v218_v62 = vsub.f32 %v1407_v8, %v1879_v47  ;;  %v1884_v63 = vand.u32 4294901760, %v1430_v48  ;;  %v1468_v47 = vld [vmem:[#allocation5 + $0x98] sm:$0xff] }
  0x2c   :  { %1955 = vst [vmem:[#allocation20_spill] sm:$0xff] %v1433_v52  ;;  %v1456_v6 = vsub.f32 %v1312_v27, %v1334_v36  ;;  %975 = vmatpush3.msra.mxu0 %v1368_v50  ;;  %v331_v26 = vand.u32 4294901760, %v330_v53  ;;  %v337_v14 = vsub.f32 %v1418_v42, %v1881_v54  ;;  %v1886_v19 = vand.u32 4294901760, %v1444_v57  ;;  %v39_v36 = vld [vmem:[#allocation2 + $0x8] sm:$0xff] }
  0x2d   :  { %1956 = vst [vmem:[#allocation21_spill] sm:$0xff] %v1447_v21  ;;  %v1466_v7 = vand.u32 4294901760, %v1435_v20  ;;  %1002 = vmatpush3.msra.mxu1 %v212_v58  ;;  %976 = vmatprep.subr.mxu0 %v1387_v60  ;;  %v219_v27 = vand.u32 4294901760, %v218_v62  ;;  %v225_v55 = vsub.f32 %v1430_v48, %v1884_v63  ;;  %v1477_v54 = vsub.f32 %v1314_v28, %v1347_v41 }
  0x2e   :  { %v1889_v53 = vand.u32 4294901760, %v1456_v6  ;;  %1003 = vmatprep.subr.mxu1 %v331_v26  ;;  %977 = vmatpush3.msra.mxu0 %v1399_v1  ;;  %v338_v44 = vand.u32 4294901760, %v337_v14  ;;  %v344_v58 = vsub.f32 %v1444_v57, %v1886_v19  ;;  %v1486_v62 = vand.u32 4294901760, %v1458_v38 }
  0x2f   :  { %1957 = vst [vmem:[#allocation22_spill] sm:$0xff] %v1466_v7  ;;  %v1490_v63 = vsub.f32 %v1336_v37, %v1368_v50  ;;  %1004 = vmatpush3.msra.mxu1 %v219_v27  ;;  %978 = vmatprep.subr.mxu0 %v1410_v12  ;;  %v226_v28 = vand.u32 4294901760, %v225_v55  ;;  %v1893_v14 = vand.u32 4294901760, %v1477_v54  ;;  %v1500_v19 = vand.u32 4294901760, %v1468_v47 }
  0x30   :  { %1958 = vst [vmem:[#allocation23_spill] sm:$0xff] %v1486_v62  ;;  %v232_v26 = vsub.f32 %v1456_v6, %v1889_v53  ;;  %1005 = vmatprep.subr.mxu1 %v338_v44  ;;  %979 = vmatpush3.msra.mxu0 %v1421_v43  ;;  %v345_v37 = vand.u32 4294901760, %v344_v58  ;;  %v1508_v55 = vsub.f32 %v1360_v46, %v1387_v60  ;;  %v1511_v33 = vand.u32 4294901760, %v1479_v49  ;;  %v1513_v53 = vld [vmem:[#allocation5 + $0x88] sm:$0xff] }
  0x31   :  { %1959 = vst [vmem:[#allocation24_spill] sm:$0xff] %v1500_v19  ;;  %v1896_v27 = vand.u32 4294901760, %v1490_v63  ;;  %1006 = vmatpush3.msra.mxu1 %v226_v28  ;;  %980 = vmatprep.subr.mxu0 %v1433_v52  ;;  %v351_v44 = vsub.f32 %v1477_v54, %v1893_v14  ;;  %v1521_v58 = vsub.f32 %v1370_v51, %v1399_v1  ;;  %v1524_v46 = vand.u32 4294901760, %v1492_v39  ;;  %v1538_v51 = vld [vmem:[#allocation5 + $0x8] sm:$0xff] }
  0x32   :  { %1960 = vst [vmem:[#allocation25_spill] sm:$0xff] %v1511_v33  ;;  %v233_v29 = vand.u32 4294901760, %v232_v26  ;;  %1007 = vmatprep.subr.mxu1 %v345_v37  ;;  %981 = vmatpush3.msra.mxu0 %v1447_v21  ;;  %v1533_v60 = vsub.f32 %v1377_v56, %v1410_v12  ;;  %v1536_v14 = vand.u32 4294901760, %v1502_v34  ;;  %v1547_v26 = vand.u32 4294901760, %v1513_v53  ;;  %v1549_v56 = vld [vmem:[#allocation5 + $0x80] sm:$0xff] }
  0x33   :  { %v239_v28 = vsub.f32 %v1490_v63, %v1896_v27  ;;  %982 = vmatprep.subr.mxu0 %v1466_v7  ;;  %v352_v37 = vand.u32 4294901760, %v351_v44  ;;  %v1544_v27 = vsub.f32 %v1389_v61, %v1421_v43  ;;  %v1964_v50 = vand.u32 4294901760, %v1508_v55  ;;  %v1572_v44 = vld [vmem:[#allocation5] sm:$0xff] }
  0x34   :  { %1961 = vst [vmem:[#allocation26_spill] sm:$0xff] %v1533_v60  ;;  %1962 = vst [vmem:[#allocation27_spill] sm:$0xff] %v1536_v14  ;;  %1008 = vmatpush3.msra.mxu1 %v233_v29  ;;  %983 = vmatpush3.msra.mxu0 %v1486_v62  ;;  %v1558_v1 = vsub.f32 %v1401_v2, %v1433_v52  ;;  %v1966_v61 = vand.u32 4294901760, %v1521_v58  ;;  %v1580_v41 = vand.u32 4294901760, %v1549_v56 }
  0x35   :  { %1963 = vst [vmem:[#allocation28_spill] sm:$0xff] %v1547_v26  ;;  %v240_v12 = vand.u32 4294901760, %v239_v28  ;;  %v358_v29 = vsub.f32 %v1508_v55, %v1964_v50  ;;  %1009 = vmatprep.subr.mxu1 %v352_v37  ;;  %984 = vmatprep.subr.mxu0 %v1500_v19  ;;  %v1566_v28 = vand.u32 4294901760, %v1538_v51  ;;  %v1570_v50 = vsub.f32 %v1412_v13, %v1447_v21 }
  0x36   :  { %1965 = vst [vmem:[#allocation29_spill] sm:$0xff] %v1558_v1  ;;  %v246_v43 = vsub.f32 %v1521_v58, %v1966_v61  ;;  %985 = vmatpush3.msra.mxu0 %v1511_v33  ;;  %v1968_v37 = vand.u32 4294901760, %v1533_v60  ;;  %v1969_v13 = vand.u32 4294901760, %v1544_v27  ;;  %v1589_v21 = vsub.f32 %v1435_v20, %v1466_v7 }
  0x37   :  { %1967 = vst [vmem:[#allocation30_spill] sm:$0xff] %v1566_v28  ;;  %1010 = vmatpush3.msra.mxu1 %v240_v12  ;;  %v359_v2 = vand.u32 4294901760, %v358_v29  ;;  %986 = vmatprep.subr.mxu0 %v1524_v46  ;;  %v1970_v30 = vand.u32 4294901760, %v1558_v1  ;;  %v1971_v20 = vand.u32 4294901760, %v1570_v50  ;;  %v41_v7 = vmul.f32 %v39_v36, %v39_v36 }
  0x38   :  { %v365_v52 = vsub.f32 %v1533_v60, %v1968_v37  ;;  %v247_v32 = vand.u32 4294901760, %v246_v43  ;;  %v253_v12 = vsub.f32 %v1544_v27, %v1969_v13  ;;  %v38_v37 = vld [vmem:[#allocation2] sm:$0xff]  ;;  %987 = vmatpush3.msra.mxu0 %v1536_v14  ;;  %v1596_v60 = vand.u32 4294901760, %v1572_v44 }
  0x39   :  { %1011 = vmatprep.subr.mxu1 %v359_v2  ;;  %v372_v43 = vsub.f32 %v1558_v1, %v1970_v30  ;;  %v1600_v13 = vsub.f32 %v1458_v38, %v1486_v62  ;;  %988 = vmatprep.subr.mxu0 %v1547_v26  ;;  %v1922_v2 = vand.u32 4294901760, %v1589_v21  ;;  %v1611_v38 = vsub.f32 %v1468_v47, %v1500_v19 }
  0x3a   :  { %v366_v61 = vand.u32 4294901760, %v365_v52  ;;  %1012 = vmatpush3.msra.mxu1 %v247_v32  ;;  %v254_v29 = vand.u32 4294901760, %v253_v12  ;;  %v260_v52 = vsub.f32 %v1570_v50, %v1971_v20  ;;  %989 = vmatpush3.msra.mxu0 %v1566_v28  ;;  %v40_v32 = vmul.f32 %v38_v37, %v38_v37 }
  0x3b   :  { %v373_v30 = vand.u32 4294901760, %v372_v43  ;;  %v1921_v1 = vand.u32 4294901760, %v1600_v13  ;;  %990 = vmatprep.subr.mxu0 %v1580_v41  ;;  %v379_v20 = vsub.f32 %v1589_v21, %v1922_v2  ;;  %v1617_v36 = vand.u32 4294901760, %v41_v7 }
  0x3c   :  { %1013 = vmatprep.subr.mxu1 %v366_v61  ;;  %v261_v12 = vand.u32 4294901760, %v260_v52  ;;  %v1621_v61 = vsub.f32 %v1479_v49, %v1511_v33  ;;  %991 = vmatpush3.msra.mxu0 %v1596_v60  ;;  %v1628_v37 = vand.u32 4294901760, %v40_v32  ;;  %v1632_v43 = vsub.f32 %v1492_v39, %v1524_v46 }
  0x3d   :  { %1014 = vmatpush3.msra.mxu1 %v254_v29  ;;  %1972 = vst [vmem:[#allocation31_spill] sm:$0xff] %v1617_v36  ;;  %v267_v47 = vsub.f32 %v1600_v13, %v1921_v1  ;;  %v1925_v29 = vand.u32 4294901760, %v1611_v38  ;;  %v380_v52 = vand.u32 4294901760, %v379_v20  ;;  %v1635_v49 = vsub.f32 %v41_v7, %v1617_v36  ;;  %1030 = vmatprep.subr.mxu0 %v1289_v18 }
  0x3e   :  { %1015 = vmatprep.subr.mxu1 %v373_v30  ;;  %1973 = vst [vmem:[#allocation32_spill] sm:$0xff] %v1628_v37  ;;  %v1926_v30 = vand.u32 4294901760, %v1621_v61  ;;  %v1641_v1 = vsub.f32 %v1502_v34, %v1536_v14  ;;  %v1647_v39 = vsub.f32 %v40_v32, %v1628_v37  ;;  %411 = vmatprep.mubr.f32.mxu1 %v1617_v36 }
  0x3f   :  { %1016 = vmatpush3.msra.mxu1 %v261_v12  ;;  %v268_v2 = vand.u32 4294901760, %v267_v47  ;;  %v386_v33 = vsub.f32 %v1611_v38, %v1925_v29  ;;  %v1929_v12 = vand.u32 4294901760, %v1632_v43  ;;  %v1658_v47 = vsub.f32 %v1513_v53, %v1547_v26 }
  0x40   :  { %1017 = vmatprep.subr.mxu1 %v380_v52  ;;  %v274_v34 = vsub.f32 %v1621_v61, %v1926_v30  ;;  %v1940_v29 = vand.u32 4294901760, %v1647_v39  ;;  %v1666_v7 = vsub.f32 %v1538_v51, %v1566_v28  ;;  %v1974_v30 = vand.u32 4294901760, %v1635_v49 }
  0x41   :  { %1018 = vmatpush3.msra.mxu1 %v268_v2  ;;  %v387_v32 = vand.u32 4294901760, %v386_v33  ;;  %v393_v52 = vsub.f32 %v1632_v43, %v1929_v12  ;;  %v1975_v53 = vand.u32 4294901760, %v1641_v1  ;;  %v1939_v33 = vand.u32 4294901760, %v1658_v47 }
  0x42   :  { %v173_v20 = vsub.f32 %v1635_v49, %v1974_v30  ;;  %v275_v36 = vand.u32 4294901760, %v274_v34  ;;  %v179_v12 = vsub.f32 %v1647_v39, %v1940_v29  ;;  %v1938_v51 = vand.u32 4294901760, %v1666_v7 }
  0x43   :  { %v281_v2 = vsub.f32 %v1641_v1, %v1975_v53  ;;  %1019 = vmatprep.subr.mxu1 %v387_v32  ;;  %v394_v26 = vand.u32 4294901760, %v393_v52  ;;  %v1681_v28 = vsub.f32 %v1549_v56, %v1580_v41  ;;  %v400_v53 = vsub.f32 %v1658_v47, %v1939_v33  ;;  %v1990_v33 = vld [vmem:[#allocation22_spill] sm:$0xff] }
  0x44   :  { %v174_v30 = vand.u32 4294901760, %v173_v20  ;;  %1020 = vmatpush3.msra.mxu1 %v275_v36  ;;  %v1688_v32 = vsub.f32 %v1572_v44, %v1596_v60  ;;  %v180_v14 = vand.u32 4294901760, %v179_v12  ;;  %v288_v52 = vsub.f32 %v1666_v7, %v1938_v51  ;;  %v1989_v51 = vld [vmem:[#allocation21_spill] sm:$0xff] }
  0x45   :  { %v282_v34 = vand.u32 4294901760, %v281_v2  ;;  %1021 = vmatprep.subr.mxu1 %v394_v26  ;;  %v1937_v56 = vand.u32 4294901760, %v1681_v28  ;;  %v401_v36 = vand.u32 4294901760, %v400_v53  ;;  %v1979_v53 = vld [vmem:[#allocation12_spill] sm:$0xff]  ;;  %v1991_v29 = vand.u32 4294901760, %v1289_v18 }
  0x46   :  { %1976 = vst [vmem:[#allocation33_spill] sm:$0xff] %v1688_v32  ;;  %175 = vmatprep.mubr.f32.mxu0 %v174_v30  ;;  %v1936_v20 = vand.u32 4294901760, %v1688_v32  ;;  %v289_v2 = vand.u32 4294901760, %v288_v52  ;;  %v1980_v52 = vld [vmem:[#allocation29_spill] sm:$0xff]  ;;  %v1998_v18 = vand.u32 4294901760, %v1331_v35 }
  0x47   :  { %1022 = vmatpush3.msra.mxu1 %v282_v34  ;;  %181 = vmatmul.mubr.f32.vlgmr.msra.gmra.mxu0 %v180_v14  ;;  %v407_v44 = vsub.f32 %v1681_v28, %v1937_v56  ;;  %v1977_v14 = vld [vmem:[#allocation26_spill] sm:$0xff]  ;;  %v1978_v34 = vld [vmem:[#allocation11_spill] sm:$0xff]  ;;  %v1988_v56 = vld [vmem:[#allocation20_spill] sm:$0xff] }
  0x48   :  { %1031 = vmatpush3.msra.mxu0 %v1302_v23  ;;  %1023 = vmatprep.subr.mxu1 %v401_v36  ;;  %v295_v26 = vsub.f32 %v1688_v32, %v1936_v20  ;;  %v1981_v36 = vld [vmem:[#allocation13_spill] sm:$0xff]  ;;  %v1987_v20 = vld [vmem:[#allocation19_spill] sm:$0xff] }
  0x49   :  { %1032 = vmatprep.subr.mxu0 %v1308_v25  ;;  %1024 = vmatpush3.msra.mxu1 %v289_v2  ;;  %v408_v12 = vand.u32 4294901760, %v407_v44  ;;  %v1982_v2 = vld [vmem:[#allocation14_spill] sm:$0xff]  ;;  %v1983_v44 = vld [vmem:[#allocation15_spill] sm:$0xff] }
  0x4a   :  { %1033 = vmatpush3.msra.mxu0 %v1322_v31  ;;  %v296_v30 = vand.u32 4294901760, %v295_v26  ;;  %548 = vmatprep.mubr.f32.mxu0 %v1635_v49  ;;  %v1984_v26 = vld [vmem:[#allocation16_spill] sm:$0xff] }
  0x4b   :  { %1034 = vmatprep.subr.mxu0 %v1331_v35  ;;  %1025 = vmatprep.subr.mxu1 %v408_v12  ;;  %v1985_v12 = vld [vmem:[#allocation17_spill] sm:$0xff]  ;;  %v2004_v35 = vand.u32 4294901760, %v1647_v39 }
  0x4c   :  { %1035 = vmatpush3.msra.mxu0 %v1344_v40  ;;  %1026 = vmatpush3.msra.mxu1 %v296_v30  ;;  %v1986_v30 = vld [vmem:[#allocation18_spill] sm:$0xff] }
  0x4d   :  { %1036 = vmatprep.subr.mxu0 %v1358_v45  ;;  %413 = vmatmul.mubr.f32.vlgmr.msra.gmra.mxu1 %v1628_v37  ;;  %v1992_v37 = vld [vmem:[#allocation25_spill] sm:$0xff] }
  0x4e   :  { %1037 = vmatpush3.msra.mxu0 %v1384_v59  ;;  %1065 = vmatprep.subr.mxu1 %v1269_v3 }
  0x4f   :  { %1038 = vmatprep.subr.mxu0 %v1396_v0  ;;  %1066 = vmatpush3.msra.mxu1 %v1271_v4 }
  0x50   :  { %1039 = vmatpush3.msra.mxu0 %v1407_v8  ;;  %1067 = vmatprep.subr.mxu1 %v1273_v5 }
  0x51   :  { %1040 = vmatprep.subr.mxu0 %v1418_v42  ;;  %1068 = vmatpush3.msra.mxu1 %v1275_v9 }
  0x52   :  { %1041 = vmatpush3.msra.mxu0 %v1430_v48  ;;  %1069 = vmatprep.subr.mxu1 %v1277_v10 }
  0x53   :  { %1042 = vmatprep.subr.mxu0 %v1444_v57  ;;  %1070 = vmatpush3.msra.mxu1 %v1279_v11 }
  0x54   :  { %1043 = vmatpush3.msra.mxu0 %v1456_v6  ;;  %1071 = vmatprep.subr.mxu1 %v1282_v15 }
  0x55   :  { %1044 = vmatprep.subr.mxu0 %v1477_v54  ;;  %1072 = vmatpush3.msra.mxu1 %v1284_v16 }
  0x56   :  { %1045 = vmatpush3.msra.mxu0 %v1490_v63  ;;  %1073 = vmatprep.subr.mxu1 %v1286_v17 }
  0x57   :  { %1046 = vmatprep.subr.mxu0 %v1508_v55  ;;  %1074 = vmatpush3.msra.mxu1 %v1299_v22 }
  0x58   :  { %1047 = vmatpush3.msra.mxu0 %v1521_v58  ;;  %1075 = vmatprep.subr.mxu1 %v1305_v24 }
  0x59   :  { %1048 = vmatprep.subr.mxu0 %v1977_v14  ;;  %1076 = vmatpush3.msra.mxu1 %v1978_v34 }
  0x5a   :  { %1049 = vmatpush3.msra.mxu0 %v1544_v27  ;;  %1077 = vmatprep.subr.mxu1 %v1979_v53 }
  0x5b   :  { %1050 = vmatprep.subr.mxu0 %v1980_v52  ;;  %1078 = vmatpush3.msra.mxu1 %v1981_v36 }
  0x5c   :  { %1051 = vmatpush3.msra.mxu0 %v1570_v50  ;;  %1079 = vmatprep.subr.mxu1 %v1982_v2 }
  0x5d   :  { %1052 = vmatprep.subr.mxu0 %v1589_v21  ;;  %1080 = vmatpush3.msra.mxu1 %v1983_v44 }
  0x5e   :  { %1053 = vmatpush3.msra.mxu0 %v1600_v13  ;;  %1081 = vmatprep.subr.mxu1 %v1984_v26 }
  0x5f   :  { %1054 = vmatprep.subr.mxu0 %v1611_v38  ;;  %1082 = vmatpush3.msra.mxu1 %v1985_v12 }
  0x60   :  { %1055 = vmatpush3.msra.mxu0 %v1621_v61  ;;  %1083 = vmatprep.subr.mxu1 %v1986_v30 }
  0x61   :  { %1056 = vmatprep.subr.mxu0 %v1632_v43  ;;  %1084 = vmatpush3.msra.mxu1 %v1987_v20 }
  0x62   :  { %1057 = vmatpush3.msra.mxu0 %v1641_v1  ;;  %1085 = vmatprep.subr.mxu1 %v1988_v56 }
  0x63   :  { %1058 = vmatprep.subr.mxu0 %v1658_v47  ;;  %1086 = vmatpush3.msra.mxu1 %v1989_v51  ;;  %v1993_v51 = vand.u32 4294901760, %v1302_v23  ;;  %v2000_v23 = vand.u32 4294901760, %v1344_v40  ;;  %v2006_v40 = vand.u32 4294901760, %v1407_v8  ;;  %v2021_v8 = vand.u32 4294901760, %v1611_v38  ;;  %v2035_v38 = vld [vmem:[#allocation24_spill] sm:$0xff] }
  0x64   :  { %1059 = vmatpush3.msra.mxu0 %v1666_v7  ;;  %1087 = vmatprep.subr.mxu1 %v1990_v33  ;;  %v1994_v33 = vand.u32 4294901760, %v1308_v25  ;;  %v2001_v25 = vand.u32 4294901760, %v1358_v45  ;;  %v2007_v45 = vand.u32 4294901760, %v1418_v42  ;;  %v2022_v42 = vand.u32 4294901760, %v1621_v61 }
  0x65   :  { %1060 = vmatprep.subr.mxu0 %v1681_v28  ;;  %1088 = vmatpush3.msra.mxu1 %v1486_v62  ;;  %v1995_v62 = vld [vmem:[#allocation27_spill] sm:$0xff] }
  0x66   :  { %1061 = vmatpush3.msra.mxu0 %v1688_v32  ;;  %1089 = vmatprep.subr.mxu1 %v1500_v19  ;;  %v1996_v32 = vand.u32 4294901760, %v1322_v31  ;;  %v1997_v19 = vld [vmem:[#allocation28_spill] sm:$0xff]  ;;  %v2002_v31 = vand.u32 4294901760, %v1635_v49 }
  0x67   :  { %551 = vmatmul.mubr.f32.vlgmr.msra.gmra.mxu0 %v1647_v39  ;;  %1100 = vmatprep.subr.mxu0 %v1991_v29  ;;  %v1999_v29 = vld [vmem:[#allocation30_spill] sm:$0xff] }
  0x68   :  { %1090 = vmatpush3.msra.mxu1 %v1992_v37  ;;  %1101 = vmatpush3.msra.mxu0 %v1993_v51  ;;  %v2005_v51 = vand.u32 4294901760, %v1396_v0  ;;  %v2009_v0 = vand.u32 4294901760, %v1444_v57  ;;  %v2025_v57 = vand.u32 4294901760, %v1658_v47 }
  0x69   :  { %1091 = vmatprep.subr.mxu1 %v1524_v46  ;;  %1102 = vmatprep.subr.mxu0 %v1994_v33  ;;  %v2003_v33 = vand.u32 4294901760, %v1384_v59  ;;  %v2008_v59 = vand.u32 4294901760, %v1430_v48  ;;  %v2023_v48 = vand.u32 4294901760, %v1632_v43 }
  0x6a   :  { %1092 = vmatpush3.msra.mxu1 %v1995_v62  ;;  %1103 = vmatpush3.msra.mxu0 %v1996_v32 }
  0x6b   :  { %1093 = vmatprep.subr.mxu1 %v1997_v19  ;;  %1104 = vmatprep.subr.mxu0 %v1998_v18 }
  0x6c   :  { %1094 = vmatpush3.msra.mxu1 %v1999_v29  ;;  %1105 = vmatpush3.msra.mxu0 %v2000_v23 }
  0x6d   :  { %1095 = vmatprep.subr.mxu1 %v1580_v41  ;;  %1106 = vmatprep.subr.mxu0 %v2001_v25 }
  0x6e   :  { %1096 = vmatpush3.msra.mxu1 %v1596_v60  ;;  %655 = vmatprep.mubr.f32.mxu1 %v2002_v31 }
  0x6f   :  { %1107 = vmatpush3.msra.mxu0 %v2003_v33  ;;  %659 = vmatmul.mubr.f32.vlgmr.msra.gmra.mxu1 %v2004_v35 }
  0x70   :  { %1108 = vmatprep.subr.mxu0 %v2005_v51  ;;  %1135 = vmatprep.subr.mxu1 %v1269_v3  ;;  %v2010_v3 = vand.u32 4294901760, %v1456_v6  ;;  %v2028_v6 = vand.u32 4294901760, %v1681_v28 }
  0x71   :  { %1109 = vmatpush3.msra.mxu0 %v2006_v40  ;;  %1136 = vmatpush3.msra.mxu1 %v1271_v4  ;;  %v2011_v4 = vand.u32 4294901760, %v1477_v54  ;;  %v2024_v54 = vand.u32 4294901760, %v1641_v1 }
  0x72   :  { %1110 = vmatprep.subr.mxu0 %v2007_v45  ;;  %1137 = vmatprep.subr.mxu1 %v1273_v5  ;;  %v2012_v5 = vand.u32 4294901760, %v1490_v63  ;;  %v2027_v63 = vld [vmem:[#allocation21_spill] sm:$0xff] }
  0x73   :  { %1111 = vmatpush3.msra.mxu0 %v2008_v59  ;;  %1138 = vmatpush3.msra.mxu1 %v1275_v9  ;;  %v2013_v9 = vand.u32 4294901760, %v1508_v55  ;;  %v2030_v55 = vld [vmem:[#allocation33_spill] sm:$0xff] }
  0x74   :  { %1112 = vmatprep.subr.mxu0 %v2009_v0  ;;  %1139 = vmatprep.subr.mxu1 %v1277_v10  ;;  %v2014_v10 = vand.u32 4294901760, %v1521_v58  ;;  %v2031_v1 = vand.u32 4294901760, %v2030_v55  ;;  %v2032_v58 = vld [vmem:[#allocation31_spill] sm:$0xff] }
  0x75   :  { %1113 = vmatpush3.msra.mxu0 %v2010_v3  ;;  %1140 = vmatpush3.msra.mxu1 %v1279_v11  ;;  %v2015_v11 = vand.u32 4294901760, %v1977_v14 }
  0x76   :  { %1114 = vmatprep.subr.mxu0 %v2011_v4  ;;  %1141 = vmatprep.subr.mxu1 %v1282_v15  ;;  %v2016_v15 = vand.u32 4294901760, %v1544_v27  ;;  %v2029_v27 = vld [vmem:[#allocation22_spill] sm:$0xff] }
  0x77   :  { %1115 = vmatpush3.msra.mxu0 %v2012_v5  ;;  %1142 = vmatpush3.msra.mxu1 %v1284_v16  ;;  %v2017_v16 = vand.u32 4294901760, %v1980_v52 }
  0x78   :  { %1116 = vmatprep.subr.mxu0 %v2013_v9  ;;  %1143 = vmatprep.subr.mxu1 %v1286_v17  ;;  %v2018_v17 = vand.u32 4294901760, %v1570_v50  ;;  %v2033_v50 = vld [vmem:[#allocation23_spill] sm:$0xff] }
  0x79   :  { %1117 = vmatpush3.msra.mxu0 %v2014_v10  ;;  %1144 = vmatpush3.msra.mxu1 %v1299_v22  ;;  %v2019_v22 = vand.u32 4294901760, %v1589_v21  ;;  %v2026_v21 = vand.u32 4294901760, %v1666_v7 }
  0x7a   :  { %1118 = vmatprep.subr.mxu0 %v2015_v11  ;;  %1145 = vmatprep.subr.mxu1 %v1305_v24  ;;  %v2020_v24 = vand.u32 4294901760, %v1600_v13  ;;  %v2034_v13 = vld [vmem:[#allocation32_spill] sm:$0xff] }
  0x7b   :  { %1119 = vmatpush3.msra.mxu0 %v2016_v15  ;;  %1146 = vmatpush3.msra.mxu1 %v1978_v34 }
  0x7c   :  { %1120 = vmatprep.subr.mxu0 %v2017_v16  ;;  %1147 = vmatprep.subr.mxu1 %v1979_v53 }
  0x7d   :  { %1121 = vmatpush3.msra.mxu0 %v2018_v17  ;;  %1148 = vmatpush3.msra.mxu1 %v1981_v36 }
  0x7e   :  { %1122 = vmatprep.subr.mxu0 %v2019_v22  ;;  %1149 = vmatprep.subr.mxu1 %v1982_v2 }
  0x7f   :  { %1123 = vmatpush3.msra.mxu0 %v2020_v24  ;;  %1150 = vmatpush3.msra.mxu1 %v1983_v44 }
  0x80   :  { %1124 = vmatprep.subr.mxu0 %v2021_v8  ;;  %1151 = vmatprep.subr.mxu1 %v1984_v26 }
  0x81   :  { %1125 = vmatpush3.msra.mxu0 %v2022_v42  ;;  %1152 = vmatpush3.msra.mxu1 %v1985_v12 }
  0x82   :  { %1126 = vmatprep.subr.mxu0 %v2023_v48  ;;  %1153 = vmatprep.subr.mxu1 %v1986_v30 }
  0x83   :  { %1127 = vmatpush3.msra.mxu0 %v2024_v54  ;;  %1154 = vmatpush3.msra.mxu1 %v1987_v20 }
  0x84   :  { %1128 = vmatprep.subr.mxu0 %v2025_v57  ;;  %1155 = vmatprep.subr.mxu1 %v1988_v56 }
  0x85   :  { %1129 = vmatpush3.msra.mxu0 %v2026_v21  ;;  %1156 = vmatpush3.msra.mxu1 %v2027_v63 }
  0x86   :  { %1130 = vmatprep.subr.mxu0 %v2028_v6  ;;  %1157 = vmatprep.subr.mxu1 %v2029_v27 }
  0x87   :  { %1131 = vmatpush3.msra.mxu0 %v2031_v1  ;;  %825 = vmatprep.mubr.f32.mxu0 %v2032_v58 }
  0x88   :  { %1158 = vmatpush3.msra.mxu1 %v2033_v50  ;;  %827 = vmatmul.mubr.f32.vlgmr.msra.gmra.mxu0 %v2034_v13 }
  0x89   :  { %1159 = vmatprep.subr.mxu1 %v2035_v38  ;;  %929 = vmatprep.mubr.f32.mxu1 %v2032_v58 }
  0x8a   :  { %1160 = vmatpush3.msra.mxu1 %v1992_v37 }
  0x8b   :  { %1161 = vmatprep.subr.mxu1 %v1524_v46 }
  0x8c   :  { %1162 = vmatpush3.msra.mxu1 %v1995_v62 }
  0x8d   :  { %1163 = vmatprep.subr.mxu1 %v1997_v19 }
  0x8e   :  { %1164 = vmatpush3.msra.mxu1 %v1999_v29 }
  0x8f   :  { %1165 = vmatprep.subr.mxu1 %v1580_v41 }
  0x90   :  { %1166 = vmatpush3.msra.mxu1 %v1596_v60 }
  0x91   :  { %931 = vmatmul.mubr.f32.vlgmr.msra.gmra.mxu1 %v2034_v13 }
 0x107   :  { %v992_v28 = vpop.f32.mrf.mxu0 }
 0x109   :  { %v993_v61 = vpop.f32.mrf.mxu0 }
 0x10a   :  { %v994_v32 = vadd.f32 %v993_v61, %v992_v28 }
 0x10d   :  { %v1027_v43 = vpop.f32.mrf.mxu1 }
 0x10f   :  { %v1028_v39 = vpop.f32.mrf.mxu1 }
 0x110   :  { %v1029_v47 = vadd.f32 %v1028_v39, %v1027_v43 }
 0x112   :  { %v415_v20 = vadd.f32 %v1029_v47, %v994_v32 }
 0x127   :  { %v1062_v49 = vpop.f32.mrf.mxu0 }
 0x129   :  { %v1063_v37 = vpop.f32.mrf.mxu0 }
 0x12a   :  { %v1064_v19 = vadd.f32 %v1063_v37, %v1062_v49 }
 0x12c   :  { %v553_v41 = vadd.f32 %v1064_v19, %v415_v20 }
 0x12f   :  { %v1097_v7 = vpop.f32.mrf.mxu1 }
 0x131   :  { %v1098_v62 = vpop.f32.mrf.mxu1 }
 0x132   :  { %v1099_v14 = vadd.f32 %v1098_v62, %v1097_v7 }
 0x134   :  { %v661_v53 = vadd.f32 %v1099_v14, %v553_v41 }
 0x148   :  { %v1132_v46 = vpop.f32.mrf.mxu0 }
 0x14a   :  { %v1133_v56 = vpop.f32.mrf.mxu0 }
 0x14b   :  { %v1134_v34 = vadd.f32 %v1133_v56, %v1132_v46 }
 0x14d   :  { %v829_v36 = vadd.f32 %v1134_v34, %v661_v53 }
 0x151   :  { %v1167_v60 = vpop.f32.mrf.mxu1 }
 0x153   :  { %v1168_v52 = vpop.f32.mrf.mxu1 }
 0x154   :  { %v1169_v2 = vadd.f32 %v1168_v52, %v1167_v60 }
 0x156   :  { %v933_v44 = vadd.f32 %v1169_v2, %v829_v36 }
 0x158   :  { %1175 = vrsqrt.f32 %v933_v44  ;;  %vm938_vm0 = vcmp.eq.f32.partialorder %v933_v44, inf  ;;  %v941_v30 = vand.u32 2147483648, %v933_v44  ;;  %vm940_vm1 = vcmp.eq.f32.partialorder %v933_v44, 0.0 }
 0x165   :  { %v1176_v26 = vpop.eup %1175 }
 0x166   :  { %v937_v12 = vmul.f32 %v1176_v26, %v933_v44 }
 0x168   :  { %v939_v18 = vsel %vm938_vm0, %v933_v44, %v937_v12 }
 0x169   :  { %v942_v29 = vsel %vm940_vm1, %v941_v30, %v939_v18 }
 0x16a   :  { %943 = vst [vmem:[#allocation7] sm:$0xff] %v942_v29 }
 0x16b   :  { %1228 = shalt.err (!%p1225_p0)
}
 0x16c   :  { %953 = dma.vmem_to_hbm [thread:$0]  %s951_s1, 128, %s1876_s2, [#allocation4]  }
 0x16d   :  { %1241 = dma.done.wait [#allocation4], 128  }
 0x16e   :  { %1242 = vsyncadd [#allocation4], 4294967168 }
 0x16f   :  { %957 = vsyncpa [#allocation3], 1 }
 0x170   :  { %958 = vsyncpa [#allocation6], 1 }
 0x171   :  { %959 = vsyncpa [#allocation4], 1 }

</bundles_post_ra>
